<compile_context>
chip_gen: v6e
topology: v6e:2x2x1
jax: 0.10.0
libtpu: 0.0.40
codegen_flags: <defaults>
</compile_context>

<pallas_src>
import math

import jax
import jax.numpy as jnp
from jax import lax
from jax.experimental import pallas as pl
from jax.experimental.pallas import tpu as pltpu


# ----------------------------------------------------------------------------
# Fused per-layer kernel, iterated over the depth axis by the grid.
# ----------------------------------------------------------------------------
def _transformer3_kernel(x_ref, w_ref, b_ref, o_ref):
    """One full layer (attention + residual, MLP + residual) per grid step.

    o_ref is the resident activation: same output block for every grid step,
    so it stays in VMEM across layers and is written to HBM only once.
    w_ref: (dim, 4*dim) bf16 slab  [Wqk(2*dim) | W1(dim) | W2(dim)]
    b_ref: (1, 4*dim)  f32  slab  [bqk(2*dim) | b1(dim) | b2(dim)]
    """
    l = pl.program_id(0)

    @pl.when(l == 0)
    def _():
        o_ref[...] = x_ref[...]          # seed the resident activation with x

    x = o_ref[...]                       # (n, dim) f32, carried layer-to-layer
    dim = x.shape[1]
    xb = x.astype(jnp.bfloat16)

    # Static slices of the packed slabs (loads straight from the VMEM block).
    wqk = w_ref[:, : 2 * dim]            # (dim, 2*dim) bf16
    w1 = w_ref[:, 2 * dim : 3 * dim]     # (dim, dim)   bf16
    w2 = w_ref[:, 3 * dim :]             # (dim, dim)   bf16
    bqk = b_ref[:, : 2 * dim]            # (1, 2*dim)   f32
    b1 = b_ref[:, 2 * dim : 3 * dim]     # (1, dim)     f32
    b2 = b_ref[:, 3 * dim :]             # (1, dim)     f32

    # ---- Attention3 (heads = 1, no 1/sqrt(d) scale) + Residual -------------
    qk = jnp.dot(xb, wqk, preferred_element_type=jnp.float32) + bqk   # (n, 2*dim)
    q = qk[:, :dim].astype(jnp.bfloat16)
    k = qk[:, dim:].astype(jnp.bfloat16)

    # dots = einsum('id,jd->ij', q, k)
    dots = lax.dot_general(q, k, (((1,), (1,)), ((), ())),
                           preferred_element_type=jnp.float32)        # (n, n)

    m = jnp.max(dots, axis=-1, keepdims=True)
    e = jnp.exp(dots - m)
    attn = e / jnp.sum(e, axis=-1, keepdims=True)   # exact; see header note

    a = jnp.dot(attn.astype(jnp.bfloat16), xb,
                preferred_element_type=jnp.float32) + x               # Residual #1

    # ---- MLP_Block3 (Linear -> ReLU -> Linear) + Residual ------------------
    h = jnp.dot(a.astype(jnp.bfloat16), w1,
                preferred_element_type=jnp.float32) + b1
    h = jnp.maximum(h, 0.0)
    y = jnp.dot(h.astype(jnp.bfloat16), w2,
                preferred_element_type=jnp.float32) + b2
    o_ref[...] = (y + a).astype(o_ref.dtype)                          # Residual #2


# ----------------------------------------------------------------------------
# Wrapper: single gridded pallas_call over depth; params are pre-packed slabs.
# ----------------------------------------------------------------------------
@jax.jit
def transformer3_forward(wslab, bslab, x):
    n, dim = x.shape
    depth = wslab.shape[0]
    assert wslab.shape == (depth, dim, 4 * dim)
    assert bslab.shape == (depth, 1, 4 * dim)

    return pl.pallas_call(
        _transformer3_kernel,
        out_shape=jax.ShapeDtypeStruct((n, dim), x.dtype),
        grid_spec=pltpu.PrefetchScalarGridSpec(
            num_scalar_prefetch=0,
            grid=(depth,),
            in_specs=[
                # x seed: full array, invariant block (last-two dims == array dims)
                pl.BlockSpec((n, dim), lambda l: (0, 0)),
                # per-layer bf16 weight slab, streamed over depth
                pl.BlockSpec((None, dim, 4 * dim), lambda l: (l, 0, 0)),
                # per-layer f32 bias slab
                pl.BlockSpec((None, 1, 4 * dim), lambda l: (l, 0, 0)),
            ],
            # resident accumulator: same block index for every grid step
            out_specs=pl.BlockSpec((n, dim), lambda l: (0, 0)),
        ),
        compiler_params=pltpu.CompilerParams(
            dimension_semantics=("arbitrary",)),   # serial carry over depth
    )(x, wslab, bslab)


# ----------------------------------------------------------------------------
# Parameter construction (deterministic, matching the PyTorch inits) and
# ONE-TIME packing into the streaming layout (done at init, not per forward).
# ----------------------------------------------------------------------------
def _xavier_uniform(key, fan_in, fan_out):
    bound = math.sqrt(6.0 / (fan_in + fan_out))
    # stored as (in, out) — i.e. transposed PyTorch Linear weight
    return jax.random.uniform(key, (fan_in, fan_out), jnp.float32, -bound, bound)


def init_transformer3_params(key, dim, depth, heads):
    assert heads == 1, "Transformer3 forward is only shape-valid for heads=1"
    wqk, bqk, w1, b1, w2, b2 = [], [], [], [], [], []
    for _ in range(depth):
        key, k0, k1, k2, k3, k4 = jax.random.split(key, 6)
        # Attention3.to_qk : Linear(dim, 2*dim), xavier weight, zero bias
        wqk.append(_xavier_uniform(k0, dim, 2 * dim))
        bqk.append(jnp.zeros((2 * dim,), jnp.float32))
        # MLP_Block3.nn1/nn2 : Linear(dim, dim), xavier weight, normal(1e-6) bias
        w1.append(_xavier_uniform(k1, dim, dim))
        b1.append(1e-6 * jax.random.normal(k3, (dim,), jnp.float32))
        w2.append(_xavier_uniform(k2, dim, dim))
        b2.append(1e-6 * jax.random.normal(k4, (dim,), jnp.float32))
    return {
        "wqk": jnp.stack(wqk), "bqk": jnp.stack(bqk),
        "w1": jnp.stack(w1), "b1": jnp.stack(b1),
        "w2": jnp.stack(w2), "b2": jnp.stack(b2),
    }


def pack_transformer3_params(params):
    """One-time packing into the kernel's streaming layout (outside the jit).

    wslab: (depth, dim, 4*dim) bf16 = [Wqk | W1 | W2]
    bslab: (depth, 1, 4*dim)   f32  = [bqk | b1 | b2]
    """
    wslab = jnp.concatenate(
        [params["wqk"], params["w1"], params["w2"]], axis=-1
    ).astype(jnp.bfloat16)
    bslab = jnp.concatenate(
        [params["bqk"], params["b1"], params["b2"]], axis=-1
    )[:, None, :].astype(jnp.float32)
    return wslab, bslab


# ----------------------------------------------------------------------------
# Pure-JAX reference (emulates the kernel's bf16-operand / f32-accumulate
# matmuls so the check is tight; weights rounded to bf16 exactly as stored).
# ----------------------------------------------------------------------------
def transformer3_reference(params, x):
    def mm(a, b):
        return jnp.dot(a.astype(jnp.bfloat16), b.astype(jnp.bfloat16),
                       preferred_element_type=jnp.float32)

    depth = params["wqk"].shape[0]
    dim = x.shape[1]
    for l in range(depth):
        qk = mm(x, params["wqk"][l]) + params["bqk"][l]
        q, k = qk[:, :dim], qk[:, dim:]
        attn = jax.nn.softmax(mm(q, k.T), axis=-1)
        a = mm(attn, x) + x
        h = jnp.maximum(mm(a, params["w1"][l]) + params["b1"][l], 0.0)
        x = mm(h, params["w2"][l]) + params["b2"][l] + a
    return x


if __name__ == "__main__":
    # Small shapes consistent with the module: tokens n=8, dim=32, depth=2,
    # heads=1 (required by the reference forward), mlp_dim unused.
    dim, depth, heads = 32, 2, 1
    n = 8

    key = jax.random.PRNGKey(0)
    key, pkey, xkey = jax.random.split(key, 3)

    params = init_transformer3_params(pkey, dim, depth, heads)
    # Pack ONCE at init — the jitted forward only sees the streaming layout.
    wslab, bslab = pack_transformer3_params(params)
    x = jax.random.normal(xkey, (n, dim), jnp.float32)

    out = transformer3_forward(wslab, bslab, x)
    out = jax.block_until_ready(out)

    ref = transformer3_reference(params, x)
    assert out.shape == (n, dim)
    # Kernel and reference use identical bf16-operand / f32-accumulate matmuls
    # and exact softmax; tolerance only absorbs transcendental / accumulation-
    # order differences between Pallas and XLA lowerings.
    assert jnp.allclose(out, ref, atol=5e-3, rtol=5e-3), "mismatch vs reference"

    print("KERNEL_OK")
</pallas_src>

<mosaic_0001>
module attributes {stable_mosaic.version = 11 : i64} {
  func.func @_transformer3_kernel(%arg0: i32, %arg1: memref<8x32xf32, #tpu.memory_space<vmem>>, %arg2: memref<1x32x128xbf16, #tpu.memory_space<vmem>>, %arg3: memref<1x1x128xf32, #tpu.memory_space<vmem>>, %arg4: memref<8x32xf32, #tpu.memory_space<vmem>>) attributes {dimension_semantics = [#tpu.dimension_semantics<arbitrary>], iteration_bounds = array<i64: 2>, scalar_prefetch = 0 : i64, scratch_operands = 0 : i64, tpu.core_type = #tpu.core_type<tc>, window_params = [{pipeline_mode = #tpu.pipeline_mode<synchronous>, transform_indices = @transform_0, window_bounds = array<i64: 8, 32>}, {transform_indices = @transform_1, window_bounds = array<i64: 1, 32, 128>}, {transform_indices = @transform_2, window_bounds = array<i64: 1, 1, 128>}, {pipeline_mode = #tpu.pipeline_mode<synchronous>, transform_indices = @transform_3, window_bounds = array<i64: 8, 32>}]} {
    %c0_i32 = arith.constant 0 : i32
    %0 = arith.cmpi eq, %arg0, %c0_i32 : i32
    %1 = arith.extui %0 : i1 to i32
    %c0_i32_0 = arith.constant 0 : i32
    %2 = arith.cmpi ne, %1, %c0_i32_0 : i32
    scf.if %2 {
      %c0_27 = arith.constant 0 : index
      %c0_28 = arith.constant 0 : index
      %49 = vector.load %arg1[%c0_27, %c0_28] : memref<8x32xf32, #tpu.memory_space<vmem>>, vector<8x32xf32>
      %c0_29 = arith.constant 0 : index
      %c0_30 = arith.constant 0 : index
      %50 = vector.load %arg4[%c0_29, %c0_30] : memref<8x32xf32, #tpu.memory_space<vmem>>, vector<8x32xf32>
      tpu.vector_store %arg4[%c0_29, %c0_30], %49 {strides = array<i32>} : memref<8x32xf32, #tpu.memory_space<vmem>>, vector<8x32xf32>,
    } else {
    }
    %c0 = arith.constant 0 : index
    %c0_1 = arith.constant 0 : index
    %3 = vector.load %arg4[%c0, %c0_1] : memref<8x32xf32, #tpu.memory_space<vmem>>, vector<8x32xf32>
    %4 = arith.truncf %3 : vector<8x32xf32> to vector<8x32xbf16>
    %c0_2 = arith.constant 0 : index
    %c0_3 = arith.constant 0 : index
    %c0_4 = arith.constant 0 : index
    %5 = vector.load %arg2[%c0_2, %c0_3, %c0_4] : memref<1x32x128xbf16, #tpu.memory_space<vmem>>, vector<1x32x64xbf16>
    %6 = vector.shape_cast %5 : vector<1x32x64xbf16> to vector<32x64xbf16>
    %c0_5 = arith.constant 0 : index
    %c0_6 = arith.constant 0 : index
    %c64 = arith.constant 64 : index
    %7 = vector.load %arg2[%c0_5, %c0_6, %c64] : memref<1x32x128xbf16, #tpu.memory_space<vmem>>, vector<1x32x32xbf16>
    %8 = vector.shape_cast %7 : vector<1x32x32xbf16> to vector<32x32xbf16>
    %c0_7 = arith.constant 0 : index
    %c0_8 = arith.constant 0 : index
    %c96 = arith.constant 96 : index
    %9 = vector.load %arg2[%c0_7, %c0_8, %c96] : memref<1x32x128xbf16, #tpu.memory_space<vmem>>, vector<1x32x32xbf16>
    %10 = vector.shape_cast %9 : vector<1x32x32xbf16> to vector<32x32xbf16>
    %c0_9 = arith.constant 0 : index
    %c0_10 = arith.constant 0 : index
    %c0_11 = arith.constant 0 : index
    %11 = vector.load %arg3[%c0_9, %c0_10, %c0_11] : memref<1x1x128xf32, #tpu.memory_space<vmem>>, vector<1x1x64xf32>
    %12 = vector.shape_cast %11 : vector<1x1x64xf32> to vector<1x64xf32>
    %c0_12 = arith.constant 0 : index
    %c0_13 = arith.constant 0 : index
    %c64_14 = arith.constant 64 : index
    %13 = vector.load %arg3[%c0_12, %c0_13, %c64_14] : memref<1x1x128xf32, #tpu.memory_space<vmem>>, vector<1x1x32xf32>
    %14 = vector.shape_cast %13 : vector<1x1x32xf32> to vector<1x32xf32>
    %c0_15 = arith.constant 0 : index
    %c0_16 = arith.constant 0 : index
    %c96_17 = arith.constant 96 : index
    %15 = vector.load %arg3[%c0_15, %c0_16, %c96_17] : memref<1x1x128xf32, #tpu.memory_space<vmem>>, vector<1x1x32xf32>
    %16 = vector.shape_cast %15 : vector<1x1x32xf32> to vector<1x32xf32>
    %cst = arith.constant dense<0.000000e+00> : vector<8x64xf32>
    %17 = tpu.matmul %4, %6, %cst {dimension_numbers = #tpu.dot_dimension_numbers<[1], [0], [0], [1], [0, 0, 1, 1], [], []>} : vector<8x32xbf16>, vector<32x64xbf16>, vector<8x64xf32> -> vector<8x64xf32>
    %18 = vector.broadcast %12 : vector<1x64xf32> to vector<8x64xf32>
    %19 = arith.addf %17, %18 : vector<8x64xf32>
    %20 = vector.extract_strided_slice %19 {offsets = [0, 0], sizes = [8, 32], strides = [1, 1]} : vector<8x64xf32> to vector<8x32xf32>
    %21 = arith.truncf %20 : vector<8x32xf32> to vector<8x32xbf16>
    %22 = vector.extract_strided_slice %19 {offsets = [0, 32], sizes = [8, 32], strides = [1, 1]} : vector<8x64xf32> to vector<8x32xf32>
    %23 = arith.truncf %22 : vector<8x32xf32> to vector<8x32xbf16>
    %cst_18 = arith.constant dense<0.000000e+00> : vector<8x8xf32>
    %24 = tpu.matmul %21, %23, %cst_18 {dimension_numbers = #tpu.dot_dimension_numbers<[1], [1], [0], [0], [0, 0, 1, 0], [], []>} : vector<8x32xbf16>, vector<8x32xbf16>, vector<8x8xf32> -> vector<8x8xf32>
    %cst_19 = arith.constant dense<0xFF800000> : vector<8xf32>
    %25 = vector.multi_reduction <maximumf>, %24, %cst_19 [1] : vector<8x8xf32> to vector<8xf32>
    %26 = vector.shape_cast %25 : vector<8xf32> to vector<8x1xf32>
    %27 = vector.broadcast %26 : vector<8x1xf32> to vector<8x8xf32>
    %28 = arith.subf %24, %27 : vector<8x8xf32>
    %29 = math.exp %28 : vector<8x8xf32>
    %cst_20 = arith.constant dense<0.000000e+00> : vector<8xf32>
    %30 = vector.multi_reduction <add>, %29, %cst_20 [1] : vector<8x8xf32> to vector<8xf32>
    %31 = vector.shape_cast %30 : vector<8xf32> to vector<8x1xf32>
    %32 = vector.broadcast %31 : vector<8x1xf32> to vector<8x8xf32>
    %33 = arith.divf %29, %32 : vector<8x8xf32>
    %34 = arith.truncf %33 : vector<8x8xf32> to vector<8x8xbf16>
    %cst_21 = arith.constant dense<0.000000e+00> : vector<8x32xf32>
    %35 = tpu.matmul %34, %4, %cst_21 {dimension_numbers = #tpu.dot_dimension_numbers<[1], [0], [0], [1], [0, 0, 1, 1], [], []>} : vector<8x8xbf16>, vector<8x32xbf16>, vector<8x32xf32> -> vector<8x32xf32>
    %36 = arith.addf %35, %3 : vector<8x32xf32>
    %37 = arith.truncf %36 : vector<8x32xf32> to vector<8x32xbf16>
    %cst_22 = arith.constant dense<0.000000e+00> : vector<8x32xf32>
    %38 = tpu.matmul %37, %8, %cst_22 {dimension_numbers = #tpu.dot_dimension_numbers<[1], [0], [0], [1], [0, 0, 1, 1], [], []>} : vector<8x32xbf16>, vector<32x32xbf16>, vector<8x32xf32> -> vector<8x32xf32>
    %39 = vector.broadcast %14 : vector<1x32xf32> to vector<8x32xf32>
    %40 = arith.addf %38, %39 : vector<8x32xf32>
    %cst_23 = arith.constant 0.000000e+00 : f32
    %41 = vector.broadcast %cst_23 : f32 to vector<8x32xf32>
    %42 = arith.maximumf %40, %41 : vector<8x32xf32>
    %43 = arith.truncf %42 : vector<8x32xf32> to vector<8x32xbf16>
    %cst_24 = arith.constant dense<0.000000e+00> : vector<8x32xf32>
    %44 = tpu.matmul %43, %10, %cst_24 {dimension_numbers = #tpu.dot_dimension_numbers<[1], [0], [0], [1], [0, 0, 1, 1], [], []>} : vector<8x32xbf16>, vector<32x32xbf16>, vector<8x32xf32> -> vector<8x32xf32>
    %45 = vector.broadcast %16 : vector<1x32xf32> to vector<8x32xf32>
    %46 = arith.addf %44, %45 : vector<8x32xf32>
    %47 = arith.addf %46, %36 : vector<8x32xf32>
    %c0_25 = arith.constant 0 : index
    %c0_26 = arith.constant 0 : index
    %48 = vector.load %arg4[%c0_25, %c0_26] : memref<8x32xf32, #tpu.memory_space<vmem>>, vector<8x32xf32>
    tpu.vector_store %arg4[%c0_25, %c0_26], %47 {strides = array<i32>} : memref<8x32xf32, #tpu.memory_space<vmem>>, vector<8x32xf32>,
    return
  }
  func.func @transform_0(%arg0: i32) -> (i32, i32) {
    %c0_i32 = arith.constant 0 : i32
    %c0_i32_0 = arith.constant 0 : i32
    %c0_i32_1 = arith.constant 0 : i32
    return %c0_i32, %c0_i32_0 : i32, i32
  }
  func.func @transform_1(%arg0: i32) -> (i32, i32, i32) {
    %c0_i32 = arith.constant 0 : i32
    %c0_i32_0 = arith.constant 0 : i32
    %c0_i32_1 = arith.constant 0 : i32
    return %arg0, %c0_i32, %c0_i32_0 : i32, i32, i32
  }
  func.func @transform_2(%arg0: i32) -> (i32, i32, i32) {
    %c0_i32 = arith.constant 0 : i32
    %c0_i32_0 = arith.constant 0 : i32
    %c0_i32_1 = arith.constant 0 : i32
    return %arg0, %c0_i32, %c0_i32_0 : i32, i32, i32
  }
  func.func @transform_3(%arg0: i32) -> (i32, i32) {
    %c0_i32 = arith.constant 0 : i32
    %c0_i32_0 = arith.constant 0 : i32
    %c0_i32_1 = arith.constant 0 : i32
    return %c0_i32, %c0_i32_0 : i32, i32
  }
}

</mosaic_0001>

<bundles_post_ra>
// kernel: transformer3_forward.1
= control target key start
LH: loop header
LB: loop body
LE: loop exit
PB: predicated region body
PF: predicated region fallthrough
CT: control target
= control target key end

     0   :  { %8 = vsyncpa [#allocation3], 0  ;;  %s1157_s0 = inlined_call_operand.hbm [shape: f32[8,32], index: 0, kind: input, shape index: {}]   ;;  %s1158_s1 = inlined_call_operand.hbm [shape: bf16[2,32,128], index: 1, kind: input, shape index: {}]   ;;  %s1159_s2 = inlined_call_operand.hbm [shape: f32[2,1,128], index: 2, kind: input, shape index: {}]   ;;  %s1160_s3 = inlined_call_operand.hbm [shape: f32[8,32], index: 3, kind: output, shape index: {}]  }
   0x1   :  { %9 = vsyncpa [#allocation6], 0 }
   0x2   :  { %11 = vsyncpa [#allocation6 + $0x1], 0 }
   0x3   :  { %12 = vsyncpa [#allocation4], 0  ;;  %s932_s12 = smov 0   ;;  %s934_s13 = smov 0  }
   0x4   :  { %s936_s14 = smov 0   ;;  %s938_s15 = smov 0  }
   0x5 LB: > { %s953_s16 = sadd.s32 1, %s899_s15   ;;  %s46_s17 = sadd.s32 1, %s895_s14  ;;  %s899_s15 = sphi %s938_s15, %s1178_s15   ;;  %s895_s14 = sphi %s936_s14, %s1177_s14   ;;  %s891_s13 = sphi %s934_s13, %s1176_s13   ;;  %s887_s12 = sphi %s932_s12, %s1175_s12  }
   0x6   : > { %s43_s18 = ssub.s32 %s899_s15, %s953_s16  ;;  %p53_p0 = scmp.ne.s32.totalorder %s895_s14, %s891_s13 }
   0x7   : > { %p44_p1 = scmp.eq.s32.totalorder %s43_s18, 0  ;;  %p54_p2 = scmp.eq.s32.totalorder %s899_s15, 0 }
   0x8   : > { %p700_p3 = scmp.lt.s32.totalorder %s899_s15, 2  ;;  %s141_s20 = sand.u32 1, %s899_s15  }
   0x9   : > { %s963_s19 = scalar_select %p44_p1, %s895_s14, %s46_s17  }
   0xa   : > { %p55_p4 = por %p54_p2, %p53_p0  ;;  %s143_s21 = sand.u32 1, %s895_s14  }
   0xb   : > { %s606_s22 = sshll.u32 %s143_s21, 4  ;;  %s626_s23 = sshll.u32 %s899_s15, 8 }
   0xc   : > { %s973_s26 = scalar_lea.hbm %s1158_s1, %s626_s23  ;;  %s145_s27 = scalar_lea.vmem [#allocation5], %s606_s22 }
   0xd   : > { %s152_s28 = sshll.u32 %s145_s27, 4  ;;  %p975_p5 = pnand %p700_p3, %p55_p4  ;;  %s979_s28 = int_to_ptr.vmem [resolvable:$true] %s152_s28 }
   0xe   : > { %s981_s30 = scalar_lea.sflag [#allocation6], %s141_s20  ;;  %s751_s4 = scalar_lea.hbm %s973_s26, 256 }
   0xf   : > { %p752_p6 = scmp.ne.s32.totalorder %s973_s26, %s751_s4  ;;  %p753_p7 = pneg %p975_p5 }
  0x10   : > { %s756_s7 = scalar_lea.hbm %s1158_s1, 512  ;;  %p757_p10 = scmp.lt.s32.totalorder %s973_s26, %s1158_s1 }
  0x11   : > { %p754_p8 = pnand %p753_p7, %p752_p6  ;;  %p758_p11 = scmp.lt.s32.totalorder %s756_s7, %s751_s4 }
  0x13   : > { %p755_p9 = pneg %p754_p8  ;;  %p759_p12 = por %p758_p11, %p757_p10 }
  0x15   : > { %p760_p13 = pnand %p759_p12, %p755_p9 }
  0x17   : > { %763 = shalt.err (!%p760_p13)
}
  0x18   : > { %s764_s10 = scalar_lea.vmem %s979_s28, 256  ;;  %s901_s11 = smov [#allocation5]  }
  0x19   : > { %p765_p0 = scmp.ne.s32.totalorder %s979_s28, %s764_s10  ;;  %s769_s17 = sshll.u32 %s901_s11, 4  ;;  %s770_s17 = int_to_ptr.vmem [resolvable:$false] %s769_s17 }
  0x1a   : > { %s771_s18 = scalar_lea.vmem %s770_s17, 512  ;;  %p772_p3 = scmp.lt.s32.totalorder %s979_s28, %s770_s17 }
  0x1b   : > { %p767_p1 = pnand %p765_p0, %p753_p7  ;;  %p773_p4 = scmp.lt.s32.totalorder %s771_s18, %s764_s10 }
  0x1d   : > { %p768_p2 = pneg %p767_p1  ;;  %p774_p6 = por %p773_p4, %p772_p3 }
  0x1f   : > { %p775_p8 = pnand %p774_p6, %p768_p2 }
  0x21   : > { %778 = shalt.err (!%p775_p8)
}
  0x22   : > { %s902_s20 = smov 64   ;;  %s903_s22 = smov 4  }
  0x23   : > { %695 = dma.hbm_to_vmem [thread:$0]  (!%p975_p5), %s973_s26, 256, %s979_s28, %s981_s30, %s902_s20, %s902_s20, %s903_s22  }
  0x24   : > { %s1009_s23 = sadd.s32 4294967295, %s899_s15   ;;  %p59_p10 = scmp.ne.s32.totalorder %s891_s13, %s887_s12 }
  0x25   : > { %p1161_p9 = scmp.eq.s32.totalorder %s1009_s23, 0  ;;  %p603_p11 = scmp.ge.s32.totalorder %s899_s15, 1 }
  0x26   : > { %p117_p12 = scmp.lt.s32.totalorder %s899_s15, 3  ;;  %s904_s26 = smov [#allocation2]  }
  0x27   : > { %p1019_p0 = por %p1161_p9, %p59_p10  ;;  %s130_s27 = sshll.u32 %s904_s26, 4  ;;  %s1027_s27 = int_to_ptr.vmem [resolvable:$true] %s130_s27 }
  0x28   : > { %p1023_p1 = pnand %p603_p11, %p117_p12  ;;  %s609_s12 = sshll.u32 %s899_s15, 4 }
  0x29   : > { %s1166_s24 = scalar_select %p1019_p0, 1, 0 }
  0x2a   : > { %s1167_s25 = scalar_select %p1023_p1, 1, 0 }
  0x2b   : > { %p688_p2 = pneg %p1023_p1  ;;  %s1035_s5 = scalar_lea.hbm %s1159_s2, %s609_s12 }
  0x2c   : > { %s165_s6 = scalar_lea.vmem [#allocation7], %s143_s21  ;;  %s779_s9 = scalar_lea.hbm %s1035_s5, 16 }
  0x2d   : > { %s172_s7 = sshll.u32 %s165_s6, 4  ;;  %p1041_p3 = pnand %p688_p2, %p1161_p9  ;;  %s173_s7 = int_to_ptr.vmem [resolvable:$true] %s172_s7 }
  0x2e   : > { %p780_p4 = scmp.ne.s32.totalorder %s1035_s5, %s779_s9  ;;  %s784_s11 = scalar_lea.hbm %s1159_s2, 32 }
  0x2f   : > { %s1168_s8 = scalar_select %p1041_p3, 1, 0 }
  0x30   : > { %p782_p6 = pnand %p780_p4, %p753_p7  ;;  %p785_p10 = scmp.lt.s32.totalorder %s1035_s5, %s1159_s2 }
  0x31   : > { %p786_p11 = scmp.lt.s32.totalorder %s784_s11, %s779_s9 }
  0x32   : > { %p783_p8 = pneg %p782_p6 }
  0x33   : > { %p787_p12 = por %p786_p11, %p785_p10 }
  0x35   : > { %p788_p2 = pnand %p787_p12, %p783_p8 }
  0x37   : > { %791 = shalt.err (!%p788_p2)
}
  0x38   : > { %s792_s21 = scalar_lea.vmem %s173_s7, 16  ;;  %s905_s20 = smov [#allocation7]  }
  0x39   : > { %p793_p13 = scmp.ne.s32.totalorder %s173_s7, %s792_s21  ;;  %s797_s22 = sshll.u32 %s905_s20, 4  ;;  %s798_s22 = int_to_ptr.vmem [resolvable:$false] %s797_s22 }
  0x3a   : > { %s799_s26 = scalar_lea.vmem %s798_s22, 32  ;;  %p800_p6 = scmp.lt.s32.totalorder %s173_s7, %s798_s22 }
  0x3b   : > { %p795_p9 = pnand %p793_p13, %p753_p7  ;;  %p801_p0 = scmp.lt.s32.totalorder %s799_s26, %s792_s21 }
  0x3d   : > { %p796_p4 = pneg %p795_p9  ;;  %p802_p1 = por %p801_p0, %p800_p6 }
  0x3f   : > { %p803_p3 = pnand %p802_p1, %p796_p4 }
  0x41   : > { %806 = shalt.err (!%p803_p3)
}
  0x42   : > { %698 = dma.hbm_to_vmem [thread:$0]  (!%p975_p5), %s1035_s5, 16, %s173_s7, %s981_s30  }
  0x43   : > { %p1169_p7 = scmp.ne.s32.totalorder %s1168_s8, 0  ;;  %s818_s12 = scalar_lea.vmem %s1027_s27, 128 }
  0x44   : > { %p819_p13 = scmp.ne.s32.totalorder %s1027_s27, %s818_s12  ;;  %p826_p11 = scmp.lt.s32.totalorder %s1027_s27, %s1027_s27 }
  0x45   : > { %p809_p9 = pneg %p1169_p7  ;;  %p827_p0 = scmp.lt.s32.totalorder %s818_s12, %s818_s12 }
  0x47   : > { %p821_p8 = pnand %p819_p13, %p809_p9  ;;  %p828_p1 = por %p827_p0, %p826_p11 }
  0x49   : > { %p822_p10 = pneg %p821_p8 }
  0x4b   : > { %p829_p3 = pnand %p828_p1, %p822_p10 }
  0x4d   : > { %832 = shalt.err (!%p829_p3)
}
  0x4e   : > { %691 = dma.hbm_to_vmem [thread:$0]  (!%p1169_p7), %s1157_s0, 128, %s1027_s27, [#allocation3]  }
  0x4f   : > { %p1170_p5 = scmp.ne.s32.totalorder %s1167_s25, 0 }
  0x50   : > { %p1171_p12 = scmp.eq.s32.totalorder (!%p1170_p5), %s1009_s23, 0 }
  0x51   : > { %181 = sbr.rel (%p1170_p5) target bundleno = 1536 (0x600), region = 32 }
  0x56   : > { %874 = dma.done.wait (%p1171_p12), [#allocation3], 128   ;;  %p1172_p2 = pmov %p1171_p12 }
  0x57   : > { %s187_s30 = sand.u32 1, %s1009_s23   ;;  %s189_s4 = sand.u32 1, %s891_s13  }
  0x58   : > { %876 = vsyncadd (%p1172_p2), [#allocation3], 4294967168  ;;  %s612_s5 = sshll.u32 %s189_s4, 4  ;;  %s188_s6 = scalar_lea.sflag [#allocation6], %s187_s30 }
  0x59   : > { %s191_s7 = scalar_lea.vmem [#allocation5], %s612_s5  ;;  %p1173_p4 = scmp.ne.s32.totalorder %s1166_s24, 0 }
  0x5b   : > { %878 = dma.done.wait (%p1173_p4), %s188_s6, 272  }
  0x5c   : > { %880 = vsyncadd (%p1173_p4), %s188_s6, 4294967024  ;;  %s199_s25 = scalar_lea.vmem [#allocation7], %s189_s4  ;;  %p1174_p6 = scmp.ne.s32.totalorder %s1009_s23, 0 }
  0x5e   : > { %225 = sbr.rel (%p1174_p6) target bundleno = 101 (0x65), region = 48 }
  0x63   : > { %v226_v0 = vld [vmem:[#allocation2] sm:$0xff]  ;;  %vm227_vm0 = vcmask 261120  }
  0x64   : > { %228 = vst.msk [vmem:[#allocation8] sm:$0xff] %vm227_vm0, %v226_v0 }
  0x65 PF: > { %v1090_v1 = vld [vmem:[%s191_s7 + $0x8] sm:$0xff]   ;;  %v906_v2 = vmov 0.0   ;;  %v1095_v3 = vld [vmem:[%s191_s7] sm:$0xff]   ;;  %vm907_vm1 = vmmov 0   ;;  %vm254_vm2 = vcmask 261120   ;;  %s908_s24 = smov 96  }
  0x66   : > { %640 = vmatprep.subr.bf16.mxu0 %v906_v2  ;;  %648 = vmatprep.subr.bf16.mxu1 %v906_v2  ;;  %v614_v6 = vld [vmem:[%s199_s25] ss:$0 sm:$0xff]  ;;  %vm348_vm3 = vcmask 64512   ;;  %vm364_vm4 = vcmask 1043456   ;;  %s909_s27 = smov 64   ;;  %s910_s8 = smov 32  }
  0x67   : > { %641 = vmatpush3.bf16.msra.mxu0 %v1090_v1  ;;  %644 = vmatprep.mubr.msk.bf16.mxu0 %vm907_vm1, %v906_v2  ;;  %s911_s9 = smov [#allocation8]   ;;  %p702_p7 = scmp.eq.s32.totalorder %s1009_s23, 1 }
  0x68   : > { %642 = vmatprep.subr.bf16.mxu0 %v906_v2  ;;  %650 = vmatprep.mubr.msk.bf16.mxu1 %vm907_vm1, %v906_v2  ;;  %s523_s15 = sshll.u32 %s911_s9, 4  ;;  %s524_s15 = int_to_ptr.vmem [resolvable:$true] %s523_s15 }
  0x69   : > { %s833_s10 = scalar_lea.vmem %s524_s15, 128  ;;  %p840_p10 = scmp.lt.s32.totalorder %s524_s15, %s524_s15 }
  0x6a   : > { %p834_p9 = scmp.ne.s32.totalorder %s524_s15, %s833_s10  ;;  %p841_p11 = scmp.lt.s32.totalorder %s833_s10, %s833_s10 }
  0x6b   : > { %v1099_v4 = vld [vmem:[#allocation8] sm:$0xff]  ;;  %643 = vmatpush3.bf16.msra.mxu0 %v1095_v3 }
  0x6c   : > { %v230_v5 = vpack.c.bf16 %v1099_v4, %v1099_v4  ;;  %654 = vmatprep.subr.bf16.mxu0 %v906_v2  ;;  %p835_p13 = pnand %p834_p9, %p702_p7  ;;  %p842_p0 = por %p841_p11, %p840_p10 }
  0x6e   : > { %645 = vmatmul.mubr.msk.bf16.vlgmr.msra.gmra.mxu0 %vm254_vm2, %v230_v5  ;;  %v365_v25 = vsel %vm364_vm4, %v230_v5, 0  ;;  %p836_p8 = pneg %p835_p13 }
  0x6f   : > { %656 = vmatprep.mubr.msk.bf16.mxu0 %vm907_vm1, %v906_v2  ;;  %655 = vmatpush3.bf16.msra.mxu0 %v365_v25 }
  0x70   : > { %668 = vmatprep.subr.bf16.mxu0 %v906_v2  ;;  %p843_p1 = pnand %p842_p0, %p836_p8 }
 0x12e   : > { %v292_v7 = vpop.f32.mrf.mxu0 }
 0x12f   : > { %v293_v8 = vadd.f32 %v614_v6, %v292_v7 }
 0x130   : > { %v646_v9 = vpop.f32.mrf.mxu0 }
 0x131   : > { %v298_v10 = vpack.c.bf16 %v293_v8, %v293_v8 }
 0x132   : > { %v295_v11 = vpop.f32.mrf.mxu0 }
 0x133   : > { %300 = vrot.lane.b32.xlu0 %v298_v10, %s908_s24 }
 0x134   : > { %v647_v12 = vpop.f32.mrf.mxu0 }
 0x1a5   : > { %v301_v13 = vpop.permute.xlu0 %300 }
 0x1a6   : > { %v306_v14 = vsel %vm254_vm2, %v301_v13, 0 }
 0x1a7   : > { %649 = vmatpush3.bf16.xpose.msra.mxu1 %v306_v14 }
 0x1a8   : > { %660 = vmatprep.subr.bf16.mxu1 %v906_v2 }
 0x1ae   : > { %651 = vmatmul.mubr.msk.bf16.vlgmr.msra.gmra.mxu1 %vm254_vm2, %v298_v10 }
 0x1af   : > { %664 = vmatprep.mubr.msk.bf16.mxu1 %vm907_vm1, %v906_v2 }
 0x26e   : > { %v342_v15 = vpop.f32.mrf.mxu1 }
 0x26f   : > { %v349_v16 = vsel %vm348_vm3, %v342_v15, -inf }
 0x270   : > { %350 = vmax.xlane.f32.xlu0 %v349_v16  ;;  %v652_v17 = vpop.f32.mrf.mxu1 }
 0x272   : > { %v345_v18 = vpop.f32.mrf.mxu1 }
 0x274   : > { %v653_v19 = vpop.f32.mrf.mxu1 }
 0x286   : > { %468 = vrot.lane.b32.xlu0 %v614_v6, %s910_s8 }
 0x2f9   : > { %v351_v20 = vpop.xlane.xlu0 %350 }
 0x2fa   : > { %v352_v21 = vsub.f32 %v342_v15, %v351_v20 }
 0x2fc   : > { %v353_v22 = vmul.f32 1.442695, %v352_v21 }
 0x2fd   : > { %v469_v48 = vpop.permute.xlu0 %468 }
 0x2fe   : > { %747 = vpow2.f32 %v353_v22 }
 0x30b   : > { %v748_v23 = vpop.eup %747 }
 0x30c   : > { %v355_v24 = vsel %vm348_vm3, %v748_v23, 0.0 }
 0x30d   : > { %356 = vadd.xlane.f32.xlu1 %v355_v24 }
 0x31e   : > { %410 = vrot.lane.b32.xlu1 %v1090_v1, %s909_s27 }
 0x322   : > { %408 = vrot.lane.b32.xlu1 %v1095_v3, %s909_s27 }
 0x326   : > { %464 = vrot.lane.b32.xlu1 %v1090_v1, %s910_s8 }
 0x32a   : > { %414 = vrot.lane.b32.xlu1 %v614_v6, %s909_s27 }
 0x32e   : > { %462 = vrot.lane.b32.xlu1 %v1095_v3, %s910_s8 }
 0x396   : > { %v357_v26 = vpop.xlane.xlu1 %356 }
 0x397   : > { %749 = vrcp.f32 %v357_v26 }
 0x39a   : > { %v411_v27 = vpop.permute.xlu1 %410 }
 0x39b   : > { %661 = vmatpush3.bf16.msra.mxu1 %v411_v27 }
 0x39c   : > { %662 = vmatprep.subr.bf16.mxu1 %v906_v2 }
 0x39e   : > { %v409_v28 = vpop.permute.xlu1 %408 }
 0x39f   : > { %663 = vmatpush3.bf16.msra.mxu1 %v409_v28 }
 0x3a2   : > { %v465_v32 = vpop.permute.xlu1 %464 }
 0x3a4   : > { %v750_v29 = vpop.eup %749 }
 0x3a5   : > { %v359_v30 = vmul.f32 %v750_v29, %v748_v23 }
 0x3a6   : > { %v415_v39 = vpop.permute.xlu1 %414 }
 0x3a7   : > { %v360_v31 = vpack.c.bf16 %v359_v30, %v359_v30 }
 0x3a9   : > { %657 = vmatmul.mubr.msk.bf16.vlgmr.msra.gmra.mxu0 %vm348_vm3, %v360_v31 }
 0x3aa   : > { %672 = vmatprep.mubr.msk.bf16.mxu0 %vm907_vm1, %v906_v2  ;;  %669 = vmatpush3.bf16.msra.mxu0 %v465_v32  ;;  %v463_v40 = vpop.permute.xlu1 %462 }
 0x3ab   : > { %670 = vmatprep.subr.bf16.mxu0 %v906_v2 }
 0x3ae   : > { %671 = vmatpush3.bf16.msra.mxu0 %v463_v40 }
 0x469   : > { %v401_v33 = vpop.f32.mrf.mxu0 }
 0x46a   : > { %v402_v34 = vadd.f32 %v401_v33, %v1099_v4 }
 0x46b   : > { %v658_v35 = vpop.f32.mrf.mxu0 }
 0x46c   : > { %v407_v36 = vpack.c.bf16 %v402_v34, %v402_v34 }
 0x46d   : > { %v404_v37 = vpop.f32.mrf.mxu0 }
 0x46e   : > { %665 = vmatmul.mubr.msk.bf16.vlgmr.msra.gmra.mxu1 %vm254_vm2, %v407_v36 }
 0x46f   : > { %v659_v38 = vpop.f32.mrf.mxu0 }
 0x52e   : > { %v454_v41 = vpop.f32.mrf.mxu1 }
 0x52f   : > { %v455_v42 = vadd.f32 %v454_v41, %v415_v39 }
 0x530   : > { %v666_v43 = vpop.f32.mrf.mxu1 }
 0x531   : > { %v460_v44 = vmax.f32 %v455_v42, 0.0 }
 0x532   : > { %v457_v45 = vpop.f32.mrf.mxu1 }
 0x533   : > { %v461_v46 = vpack.c.bf16 %v460_v44, %v460_v44 }
 0x534   : > { %v667_v47 = vpop.f32.mrf.mxu1 }
 0x535   : > { %673 = vmatmul.mubr.msk.bf16.vlgmr.msra.gmra.mxu0 %vm254_vm2, %v461_v46 }
 0x5f5   : > { %v508_v49 = vpop.f32.mrf.mxu0 }
 0x5f6   : > { %v509_v50 = vadd.f32 %v508_v49, %v469_v48 }
 0x5f7   : > { %v674_v51 = vpop.f32.mrf.mxu0 }
 0x5f8   : > { %v514_v52 = vadd.f32 %v509_v50, %v402_v34 }
 0x5f9   : > { %v511_v53 = vpop.f32.mrf.mxu0 }
 0x5fa   : > { %515 = vst.msk [vmem:[#allocation8] sm:$0xff] %vm254_vm2, %v514_v52 }
 0x5fb   : > { %v675_v54 = vpop.f32.mrf.mxu0 }
 0x5fc   : > { %846 = shalt.err (!%p843_p1)
}
 0x5fd   : > { %685 = dma.vmem_to_hbm [thread:$0]  (%p702_p7), %s524_s15, 128, %s1160_s3, [#allocation4]  }
 0x5fe   : > { %882 = dma.done.wait (%p702_p7), [#allocation4], 128  }
 0x5ff   : > { %884 = vsyncadd (%p702_p7), [#allocation4], 4294967168 }
 0x600 PF: > { %p15_p3 = scmp.ge.s32.totalorder %s953_s16, 4   ;;  %s1175_s12 = smov %s891_s13 }
 0x601   : > { %s1176_s13 = smov %s895_s14  ;;  %s1177_s14 = smov %s963_s19 }
 0x602   : > { %s1178_s15 = smov %s953_s16  ;;  %17 = sbr.rel (!%p15_p3) target bundleno = 5 (0x5), region = 89 }
 0x607   :  { %536 = vsyncpa [#allocation3], 1 }
 0x608   :  { %538 = vsyncpa [#allocation3 + $0x1], 1 }
 0x609   :  { %539 = vsyncpa [#allocation6], 1 }
 0x60a   :  { %541 = vsyncpa [#allocation6 + $0x1], 1 }
 0x60b   :  { %542 = vsyncpa [#allocation4], 1 }
 0x60c   :  { %544 = vsyncpa [#allocation4 + $0x1], 1 }

</bundles_post_ra>
